<compile_context>
chip_gen: v6e
topology: v6e:2x2x1
jax: 0.10.0
libtpu: 0.0.40
codegen_flags: <defaults>
</compile_context>

<pallas_src>
import functools

import jax
import jax.numpy as jnp
from jax.experimental import pallas as pl
from jax.experimental.pallas import tpu as pltpu


def _gem_kernel(x_ref, o_ref, *, p, inv_hw, eps):
    # x_ref: (TILE_NC, HW) tile in VMEM; o_ref: (TILE_NC, 1)
    x = x_ref[...].astype(jnp.float32)
    x = jnp.maximum(x, eps)                       # clamp(min=eps)
    if p != 1.0:
        # x ** p, written explicitly as exp(p*log(x)) -> clean EUP lowering.
        x = jnp.exp(p * jnp.log(x))
    # Mean over the full spatial extent (block covers all of HW, so the lane
    # reduction sees exactly HW real elements; divide by the true HW).
    m = jnp.sum(x, axis=-1, keepdims=True) * inv_hw
    if p != 1.0:
        m = jnp.exp((1.0 / p) * jnp.log(m))       # m ** (1/p)
    o_ref[...] = m.astype(o_ref.dtype)


def gem_pallas(x, p=1.0, eps=1e-6):
    """GeM pooling. x: (N, C, H, W) -> (N, C, 1, 1)."""
    N, C, H, W = x.shape
    NC, HW = N * C, H * W
    x2d = x.reshape(NC, HW)

    # --- pick a tile along NC: multiple of 8, block ~2 MiB after lane padding.
    lanes = ((HW + 127) // 128) * 128             # VMEM lane padding of HW
    bytes_per_row = lanes * 4                     # f32 compute footprint
    target_block_bytes = 2 * 1024 * 1024          # safe on v5e/v6e/v7x scoped VMEM
    tile_nc = max(8, min(NC, target_block_bytes // bytes_per_row))
    tile_nc = max(8, (tile_nc // 8) * 8)

    # Pad NC up to a multiple of tile_nc (padded rows are discarded below).
    nc_padded = -(-NC // tile_nc) * tile_nc
    if nc_padded != NC:
        x2d = jnp.pad(x2d, ((0, nc_padded - NC), (0, 0)))

    grid = (nc_padded // tile_nc,)

    kernel = functools.partial(
        _gem_kernel, p=float(p), inv_hw=1.0 / float(HW), eps=float(eps)
    )

    itemsize = x.dtype.itemsize
    transcendentals = 0 if float(p) == 1.0 else 2 * NC * HW
    cost = pl.CostEstimate(
        flops=2 * NC * HW,
        transcendentals=transcendentals,
        bytes_accessed=NC * HW * itemsize + NC * itemsize,
    )

    out2d = pl.pallas_call(
        kernel,
        out_shape=jax.ShapeDtypeStruct((nc_padded, 1), x.dtype),
        grid=grid,
        in_specs=[pl.BlockSpec((tile_nc, HW), lambda i: (i, 0))],
        out_specs=pl.BlockSpec((tile_nc, 1), lambda i: (i, 0)),
        compiler_params=pltpu.CompilerParams(
            dimension_semantics=("parallel",)
        ),
        cost_estimate=cost,
    )(x2d)

    return out2d[:NC].reshape(N, C, 1, 1)


def gem_reference(x, p=1.0, eps=1e-6):
    x = jnp.maximum(x, eps)
    x = x ** p
    m = jnp.mean(x, axis=(-2, -1), keepdims=True)
    return m ** (1.0 / p)


if __name__ == "__main__":
    key = jax.random.PRNGKey(0)
    x = jax.random.normal(key, (2, 4, 16, 16), dtype=jnp.float32)

    # Default module config: p=1.0, eps=1e-6 (fast path, no transcendentals).
    out = gem_pallas(x, p=1.0, eps=1e-6)
    jax.block_until_ready(out)
    ref = gem_reference(x, p=1.0, eps=1e-6)
    assert out.shape == (2, 4, 1, 1), out.shape
    assert jnp.allclose(out, ref, atol=1e-5, rtol=1e-5), (
        f"max abs err (p=1): {jnp.max(jnp.abs(out - ref))}"
    )

    # General-p path (exercises exp/log lowering).
    out3 = gem_pallas(x, p=3.0, eps=1e-6)
    jax.block_until_ready(out3)
    ref3 = gem_reference(x, p=3.0, eps=1e-6)
    assert jnp.allclose(out3, ref3, atol=1e-4, rtol=1e-4), (
        f"max abs err (p=3): {jnp.max(jnp.abs(out3 - ref3))}"
    )

    print("KERNEL_OK")
</pallas_src>

<mosaic_0001>
module attributes {stable_mosaic.version = 11 : i64} {
  func.func @_gem_kernel(%arg0: i32, %arg1: memref<8x256xf32, #tpu.memory_space<vmem>>, %arg2: memref<8x1xf32, #tpu.memory_space<vmem>>) attributes {dimension_semantics = [#tpu.dimension_semantics<parallel>], iteration_bounds = array<i64: 1>, scalar_prefetch = 0 : i64, scratch_operands = 0 : i64, tpu.core_type = #tpu.core_type<tc>, window_params = [{transform_indices = @transform_0, window_bounds = array<i64: 8, 256>}, {transform_indices = @transform_1, window_bounds = array<i64: 8, 1>}]} {
    %c0 = arith.constant 0 : index
    %c0_0 = arith.constant 0 : index
    %0 = vector.load %arg1[%c0, %c0_0] : memref<8x256xf32, #tpu.memory_space<vmem>>, vector<8x256xf32>
    %cst = arith.constant 9.99999997E-7 : f32
    %1 = vector.broadcast %cst : f32 to vector<8x256xf32>
    %2 = arith.maximumf %0, %1 : vector<8x256xf32>
    %cst_1 = arith.constant dense<0.000000e+00> : vector<8xf32>
    %3 = vector.multi_reduction <add>, %2, %cst_1 [1] : vector<8x256xf32> to vector<8xf32>
    %4 = vector.shape_cast %3 : vector<8xf32> to vector<8x1xf32>
    %cst_2 = arith.constant 3.906250e-03 : f32
    %5 = vector.broadcast %cst_2 : f32 to vector<8x1xf32>
    %6 = arith.mulf %4, %5 : vector<8x1xf32>
    %c0_3 = arith.constant 0 : index
    %c0_4 = arith.constant 0 : index
    %7 = vector.load %arg2[%c0_3, %c0_4] : memref<8x1xf32, #tpu.memory_space<vmem>>, vector<8x1xf32>
    tpu.vector_store %arg2[%c0_3, %c0_4], %6 {strides = array<i32>} : memref<8x1xf32, #tpu.memory_space<vmem>>, vector<8x1xf32>,
    return
  }
  func.func @transform_0(%arg0: i32) -> (i32, i32) {
    %c0_i32 = arith.constant 0 : i32
    %c0_i32_0 = arith.constant 0 : i32
    return %arg0, %c0_i32 : i32, i32
  }
  func.func @transform_1(%arg0: i32) -> (i32, i32) {
    %c0_i32 = arith.constant 0 : i32
    %c0_i32_0 = arith.constant 0 : i32
    return %arg0, %c0_i32 : i32, i32
  }
}

</mosaic_0001>

<bundles_post_ra>
// kernel: tpu_custom_call.1
= control target key start
LH: loop header
LB: loop body
LE: loop exit
PB: predicated region body
PF: predicated region fallthrough
CT: control target
= control target key end

     0   :  { %6 = vsyncpa [#allocation3], 0  ;;  %s58_s6 = smov [#allocation2]   ;;  %s75_s0 = inlined_call_operand.hbm [shape: f32[8,256], index: 0, kind: input, shape index: {}]   ;;  %s76_s1 = inlined_call_operand.vmem [shape: f32[8,1], index: 1, kind: output, shape index: {}]  }
   0x1   :  { %s13_s7 = sshll.u32 %s58_s6, 4  ;;  %s14_s7 = int_to_ptr.vmem [resolvable:$true] %s13_s7 }
   0x2   :  { %s44_s8 = scalar_lea.vmem %s14_s7, 256  ;;  %p49_p1 = scmp.lt.s32.totalorder %s14_s7, %s14_s7 }
   0x3   :  { %p45_p0 = scmp.ne.s32.totalorder %s14_s7, %s44_s8  ;;  %p50_p2 = scmp.lt.s32.totalorder %s44_s8, %s44_s8 }
   0x5   :  { %p51_p3 = por %p50_p2, %p49_p1 }
   0x7   :  { %p52_p4 = pnand %p51_p3, %p45_p0 }
   0x9   :  { %55 = shalt.err (!%p52_p4)
}
   0xa   :  { %16 = dma.hbm_to_vmem [thread:$0]  %s75_s0, 256, %s14_s7, [#allocation3]  }
   0xb   :  { %56 = dma.done.wait [#allocation3], 256  }
   0xc   :  { %57 = vsyncadd [#allocation3], 4294967040  ;;  %v20_v0 = vld [vmem:[#allocation2] sm:$0xff]  ;;  %v21_v1 = vld [vmem:[#allocation2 + $0x8] sm:$0xff]  ;;  %vm28_vm0 = vcmask 7168  }
   0xd   :  { %v22_v2 = vmax.f32 %v20_v0, 1e-06  ;;  %v23_v3 = vmax.f32 %v21_v1, 1e-06 }
   0xf   :  { %v24_v4 = vadd.f32 %v23_v3, %v22_v2 }
  0x11   :  { %25 = vadd.xlane.f32.xlu0 %v24_v4 }
  0x9a   :  { %v26_v5 = vpop.xlane.xlu0 %25 }
  0x9b   :  { %v27_v6 = vmul.f32 0.00390625, %v26_v5 }
  0x9d   :  { %29 = vst.msk [vmem:[%s76_s1] sm:$0xff] %vm28_vm0, %v27_v6 }
  0x9e   :  { %34 = vsyncpa [#allocation3], 1 }

</bundles_post_ra>
